<compile_context>
chip_gen: v7x
topology: tpu7x:2x2x1
jax: 0.10.0
libtpu: 0.0.40
codegen_flags: <defaults>
</compile_context>

<pallas_src>
import functools

import jax
import jax.numpy as jnp
from jax.experimental import pallas as pl
from jax.experimental.pallas import tpu as pltpu


def _round_up(x, m):
    return (x + m - 1) // m * m


def mlp_kernel(x_ref, w1_ref, b1_ref, w2_ref, b2_ref, o_ref, *, valid_cout):
    # x_ref:  [TN, Cin_p]   (compute dtype, e.g. bf16)
    # w1_ref: [Cin_p, H_p]  w2_ref: [H_p, Cout_p]   (compute dtype)
    # b1_ref: [1, H_p]      b2_ref: [1, Cout_p]     (f32)
    # o_ref:  [TN, Cout_p]  (f32)
    x = x_ref[...]

    # lin1 + bias + ReLU (MXU matmul, f32 accumulate; epilogue in f32)
    h = jnp.dot(x, w1_ref[...], preferred_element_type=jnp.float32)
    h = jnp.maximum(h + b1_ref[...], 0.0)

    # lin2 + bias (cast activations to the weight dtype for the MXU)
    z = jnp.dot(h.astype(w2_ref.dtype), w2_ref[...],
                preferred_element_type=jnp.float32)
    z = z + b2_ref[...]

    # Mask lane-padding columns so they don't affect the log_softmax normalization.
    if valid_cout < z.shape[-1]:
        col = jax.lax.broadcasted_iota(jnp.int32, z.shape, 1)
        z = jnp.where(col < valid_cout, z, jnp.float32(-1e30))

    # log_softmax along dim=1 (last axis), numerically stable, all in f32.
    z_max = jnp.max(z, axis=-1, keepdims=True)
    z_shift = z - z_max
    lse = jnp.log(jnp.sum(jnp.exp(z_shift), axis=-1, keepdims=True))
    o_ref[...] = (z_shift - lse).astype(o_ref.dtype)


def prepare_params(w1, b1, w2, b2, *, compute_dtype=jnp.bfloat16):
    """One-time prep: transpose weights to [in, out], pad feature dims to 128, cast.

    w1: [H, Cin], b1: [H], w2: [Cout, H], b2: [Cout]  (PyTorch nn.Linear layout).
    """
    hidden, cin = w1.shape
    cout, _ = w2.shape
    cin_p = _round_up(cin, 128)
    h_p = _round_up(hidden, 128)
    cout_p = _round_up(cout, 128)

    w1_t = jnp.zeros((cin_p, h_p), compute_dtype).at[:cin, :hidden].set(
        jnp.transpose(w1).astype(compute_dtype))
    b1_p = jnp.zeros((1, h_p), jnp.float32).at[0, :hidden].set(b1.astype(jnp.float32))
    w2_t = jnp.zeros((h_p, cout_p), compute_dtype).at[:hidden, :cout].set(
        jnp.transpose(w2).astype(compute_dtype))
    b2_p = jnp.zeros((1, cout_p), jnp.float32).at[0, :cout].set(b2.astype(jnp.float32))

    return {"w1": w1_t, "b1": b1_p, "w2": w2_t, "b2": b2_p,
            "cin": cin, "hidden": hidden, "cout": cout}


def mlp_forward(x, params, *, block_rows=512):
    """x: [N, Cin] (f32). Returns log_softmax(lin2(relu(lin1(x)))), shape [N, Cout]."""
    n, cin = x.shape
    w1, b1, w2, b2 = params["w1"], params["b1"], params["w2"], params["b2"]
    cout = params["cout"]
    cin_p, h_p = w1.shape
    cout_p = w2.shape[1]
    compute_dtype = w1.dtype

    # Row tile: multiple of 16 (bf16 sublane tile) and capped by block_rows.
    tn = min(block_rows, _round_up(n, 16))
    tn = _round_up(tn, 16)
    n_pad = _round_up(n, tn)
    grid = (n_pad // tn,)

    # Pad rows + feature lanes once (zero padding contributes exactly 0 to the matmuls).
    x_p = jnp.zeros((n_pad, cin_p), compute_dtype).at[:n, :cin].set(
        x.astype(compute_dtype))

    itemsize = jnp.dtype(compute_dtype).itemsize
    # Resident weights + double-buffered x/out tiles + live f32 intermediates.
    vmem_need = (
        (w1.size + w2.size) * itemsize + (b1.size + b2.size) * 4
        + 2 * tn * cin_p * itemsize          # pipelined x blocks
        + 2 * tn * cout_p * 4                # pipelined out blocks
        + tn * h_p * 4 + tn * cout_p * 4     # h, z intermediates
    )
    vmem_limit = int(min(max(2 * vmem_need, 32 << 20), 48 << 20))

    cost = pl.CostEstimate(
        flops=2 * n_pad * (cin_p * h_p + h_p * cout_p),
        transcendentals=n_pad * (cout_p + 1),
        bytes_accessed=int(x_p.size * itemsize
                           + (w1.size + w2.size) * itemsize
                           + (b1.size + b2.size) * 4
                           + n_pad * cout_p * 4),
    )

    kernel = functools.partial(mlp_kernel, valid_cout=cout)

    out = pl.pallas_call(
        kernel,
        out_shape=jax.ShapeDtypeStruct((n_pad, cout_p), jnp.float32),
        grid=grid,
        in_specs=[
            pl.BlockSpec((tn, cin_p), lambda i: (i, 0)),       # x: row-tiled
            pl.BlockSpec((cin_p, h_p), lambda i: (0, 0)),      # w1: resident
            pl.BlockSpec((1, h_p), lambda i: (0, 0)),          # b1: resident
            pl.BlockSpec((h_p, cout_p), lambda i: (0, 0)),     # w2: resident
            pl.BlockSpec((1, cout_p), lambda i: (0, 0)),       # b2: resident
        ],
        out_specs=pl.BlockSpec((tn, cout_p), lambda i: (i, 0)),
        compiler_params=pltpu.CompilerParams(
            dimension_semantics=("parallel",),
            vmem_limit_bytes=vmem_limit,
        ),
        cost_estimate=cost,
    )(x_p, w1, b1, w2, b2)

    return out[:n, :cout]


def init_linear_params(key, out_features, in_features):
    """Deterministic init mimicking torch.nn.Linear defaults (uniform +/- 1/sqrt(fan_in))."""
    kw, kb = jax.random.split(key)
    bound = 1.0 / jnp.sqrt(jnp.asarray(in_features, jnp.float32))
    w = jax.random.uniform(kw, (out_features, in_features), jnp.float32, -bound, bound)
    b = jax.random.uniform(kb, (out_features,), jnp.float32, -bound, bound)
    return w, b


def reference(x, w1, b1, w2, b2, compute_dtype):
    """Plain-JAX reference applying the same operand rounding as the kernel."""
    f32 = jnp.float32
    hp = jax.lax.Precision.HIGHEST
    xc = x.astype(compute_dtype).astype(f32)
    w1c = w1.astype(compute_dtype).astype(f32)
    w2c = w2.astype(compute_dtype).astype(f32)
    h = jnp.maximum(jnp.dot(xc, w1c.T, precision=hp) + b1, 0.0)
    hc = h.astype(compute_dtype).astype(f32)
    z = jnp.dot(hc, w2c.T, precision=hp) + b2
    return jax.nn.log_softmax(z, axis=1)


if __name__ == "__main__":
    key = jax.random.PRNGKey(0)
    k_x, k_l1, k_l2 = jax.random.split(key, 3)

    # Small shapes consistent with the module (Cora-like: nodes x features).
    N, in_channels, hidden_channels, out_channels = 64, 32, 64, 16

    x = jax.random.normal(k_x, (N, in_channels), jnp.float32)
    w1, b1 = init_linear_params(k_l1, hidden_channels, in_channels)
    w2, b2 = init_linear_params(k_l2, out_channels, hidden_channels)

    # Default path: bf16 matmul operands (halves HBM traffic), f32 accumulate/epilogue.
    params_bf16 = prepare_params(w1, b1, w2, b2, compute_dtype=jnp.bfloat16)
    out = mlp_forward(x, params_bf16)
    jax.block_until_ready(out)
    assert out.shape == (N, out_channels)
    ref_bf16 = reference(x, w1, b1, w2, b2, jnp.bfloat16)
    assert jnp.allclose(out, ref_bf16, atol=1e-4, rtol=1e-4), float(
        jnp.max(jnp.abs(out - ref_bf16)))

    # Full-f32 path matches the exact PyTorch forward semantics.
    params_f32 = prepare_params(w1, b1, w2, b2, compute_dtype=jnp.float32)
    out_f32 = mlp_forward(x, params_f32)
    jax.block_until_ready(out_f32)
    ref_f32 = reference(x, w1, b1, w2, b2, jnp.float32)
    assert jnp.allclose(out_f32, ref_f32, atol=1e-5, rtol=1e-5), float(
        jnp.max(jnp.abs(out_f32 - ref_f32)))

    print("KERNEL_OK")
</pallas_src>

<mosaic_0001>
module attributes {stable_mosaic.version = 11 : i64} {
  func.func @mlp_kernel(%arg0: i32, %arg1: memref<64x128xbf16, #tpu.memory_space<vmem>>, %arg2: memref<128x128xbf16, #tpu.memory_space<vmem>>, %arg3: memref<1x128xf32, #tpu.memory_space<vmem>>, %arg4: memref<128x128xbf16, #tpu.memory_space<vmem>>, %arg5: memref<1x128xf32, #tpu.memory_space<vmem>>, %arg6: memref<64x128xf32, #tpu.memory_space<vmem>>) attributes {dimension_semantics = [#tpu.dimension_semantics<parallel>], iteration_bounds = array<i64: 1>, scalar_prefetch = 0 : i64, scratch_operands = 0 : i64, tpu.core_type = #tpu.core_type<tc>, window_params = [{transform_indices = @transform_0, window_bounds = array<i64: 64, 128>}, {pipeline_mode = #tpu.pipeline_mode<synchronous>, transform_indices = @transform_1, window_bounds = array<i64: 128, 128>}, {pipeline_mode = #tpu.pipeline_mode<synchronous>, transform_indices = @transform_2, window_bounds = array<i64: 1, 128>}, {pipeline_mode = #tpu.pipeline_mode<synchronous>, transform_indices = @transform_3, window_bounds = array<i64: 128, 128>}, {pipeline_mode = #tpu.pipeline_mode<synchronous>, transform_indices = @transform_4, window_bounds = array<i64: 1, 128>}, {transform_indices = @transform_5, window_bounds = array<i64: 64, 128>}]} {
    %c0 = arith.constant 0 : index
    %c0_0 = arith.constant 0 : index
    %0 = vector.load %arg1[%c0, %c0_0] : memref<64x128xbf16, #tpu.memory_space<vmem>>, vector<64x128xbf16>
    %c0_1 = arith.constant 0 : index
    %c0_2 = arith.constant 0 : index
    %1 = vector.load %arg2[%c0_1, %c0_2] : memref<128x128xbf16, #tpu.memory_space<vmem>>, vector<128x128xbf16>
    %cst = arith.constant dense<0.000000e+00> : vector<64x128xf32>
    %2 = tpu.matmul %0, %1, %cst {dimension_numbers = #tpu.dot_dimension_numbers<[1], [0], [0], [1], [0, 0, 1, 1], [], []>} : vector<64x128xbf16>, vector<128x128xbf16>, vector<64x128xf32> -> vector<64x128xf32>
    %c0_3 = arith.constant 0 : index
    %c0_4 = arith.constant 0 : index
    %3 = vector.load %arg3[%c0_3, %c0_4] : memref<1x128xf32, #tpu.memory_space<vmem>>, vector<1x128xf32>
    %4 = vector.broadcast %3 : vector<1x128xf32> to vector<64x128xf32>
    %5 = arith.addf %2, %4 : vector<64x128xf32>
    %cst_5 = arith.constant 0.000000e+00 : f32
    %6 = vector.broadcast %cst_5 : f32 to vector<64x128xf32>
    %7 = arith.maximumf %5, %6 : vector<64x128xf32>
    %8 = arith.truncf %7 : vector<64x128xf32> to vector<64x128xbf16>
    %c0_6 = arith.constant 0 : index
    %c0_7 = arith.constant 0 : index
    %9 = vector.load %arg4[%c0_6, %c0_7] : memref<128x128xbf16, #tpu.memory_space<vmem>>, vector<128x128xbf16>
    %cst_8 = arith.constant dense<0.000000e+00> : vector<64x128xf32>
    %10 = tpu.matmul %8, %9, %cst_8 {dimension_numbers = #tpu.dot_dimension_numbers<[1], [0], [0], [1], [0, 0, 1, 1], [], []>} : vector<64x128xbf16>, vector<128x128xbf16>, vector<64x128xf32> -> vector<64x128xf32>
    %c0_9 = arith.constant 0 : index
    %c0_10 = arith.constant 0 : index
    %11 = vector.load %arg5[%c0_9, %c0_10] : memref<1x128xf32, #tpu.memory_space<vmem>>, vector<1x128xf32>
    %12 = vector.broadcast %11 : vector<1x128xf32> to vector<64x128xf32>
    %13 = arith.addf %10, %12 : vector<64x128xf32>
    %14 = tpu.iota {dimensions = array<i32: 1>} : vector<64x128xi32>
    %c16_i32 = arith.constant 16 : i32
    %15 = vector.broadcast %c16_i32 : i32 to vector<64x128xi32>
    %16 = arith.cmpi slt, %14, %15 : vector<64x128xi32>
    %cst_11 = arith.constant -1.000000e+30 : f32
    %17 = vector.broadcast %cst_11 : f32 to vector<64x128xf32>
    %18 = arith.select %16, %13, %17 : vector<64x128xi1>, vector<64x128xf32>
    %cst_12 = arith.constant dense<0xFF800000> : vector<64xf32>
    %19 = vector.multi_reduction <maximumf>, %18, %cst_12 [1] : vector<64x128xf32> to vector<64xf32>
    %20 = vector.shape_cast %19 : vector<64xf32> to vector<64x1xf32>
    %21 = vector.broadcast %20 : vector<64x1xf32> to vector<64x128xf32>
    %22 = arith.subf %18, %21 : vector<64x128xf32>
    %23 = math.exp %22 : vector<64x128xf32>
    %cst_13 = arith.constant dense<0.000000e+00> : vector<64xf32>
    %24 = vector.multi_reduction <add>, %23, %cst_13 [1] : vector<64x128xf32> to vector<64xf32>
    %25 = vector.shape_cast %24 : vector<64xf32> to vector<64x1xf32>
    %26 = math.log %25 : vector<64x1xf32>
    %27 = vector.broadcast %26 : vector<64x1xf32> to vector<64x128xf32>
    %28 = arith.subf %22, %27 : vector<64x128xf32>
    %c0_14 = arith.constant 0 : index
    %c0_15 = arith.constant 0 : index
    %29 = vector.load %arg6[%c0_14, %c0_15] : memref<64x128xf32, #tpu.memory_space<vmem>>, vector<64x128xf32>
    tpu.vector_store %arg6[%c0_14, %c0_15], %28 {strides = array<i32>} : memref<64x128xf32, #tpu.memory_space<vmem>>, vector<64x128xf32>,
    return
  }
  func.func @transform_0(%arg0: i32) -> (i32, i32) {
    %c0_i32 = arith.constant 0 : i32
    %c0_i32_0 = arith.constant 0 : i32
    return %arg0, %c0_i32 : i32, i32
  }
  func.func @transform_1(%arg0: i32) -> (i32, i32) {
    %c0_i32 = arith.constant 0 : i32
    %c0_i32_0 = arith.constant 0 : i32
    %c0_i32_1 = arith.constant 0 : i32
    return %c0_i32, %c0_i32_0 : i32, i32
  }
  func.func @transform_2(%arg0: i32) -> (i32, i32) {
    %c0_i32 = arith.constant 0 : i32
    %c0_i32_0 = arith.constant 0 : i32
    %c0_i32_1 = arith.constant 0 : i32
    return %c0_i32, %c0_i32_0 : i32, i32
  }
  func.func @transform_3(%arg0: i32) -> (i32, i32) {
    %c0_i32 = arith.constant 0 : i32
    %c0_i32_0 = arith.constant 0 : i32
    %c0_i32_1 = arith.constant 0 : i32
    return %c0_i32, %c0_i32_0 : i32, i32
  }
  func.func @transform_4(%arg0: i32) -> (i32, i32) {
    %c0_i32 = arith.constant 0 : i32
    %c0_i32_0 = arith.constant 0 : i32
    %c0_i32_1 = arith.constant 0 : i32
    return %c0_i32, %c0_i32_0 : i32, i32
  }
  func.func @transform_5(%arg0: i32) -> (i32, i32) {
    %c0_i32 = arith.constant 0 : i32
    %c0_i32_0 = arith.constant 0 : i32
    return %arg0, %c0_i32 : i32, i32
  }
}

</mosaic_0001>

<bundles_post_ra>
// kernel: tpu_custom_call.1
= control target key start
LH: loop header
LB: loop body
LE: loop exit
PB: predicated region body
PF: predicated region fallthrough
CT: control target
= control target key end

     0   :  { %10 = vsyncpa [#allocation3], 0  ;;  %s892_s0 = inlined_call_operand.hbm [shape: bf16[64,128], index: 0, kind: input, shape index: {}]   ;;  %s893_s1 = inlined_call_operand.hbm [shape: bf16[128,128], index: 1, kind: input, shape index: {}]   ;;  %s894_s2 = inlined_call_operand.vmem [shape: f32[1,128], index: 2, kind: input, shape index: {}]   ;;  %s895_s3 = inlined_call_operand.hbm [shape: bf16[128,128], index: 3, kind: input, shape index: {}]   ;;  %s896_s4 = inlined_call_operand.vmem [shape: f32[1,128], index: 4, kind: input, shape index: {}]   ;;  %s897_s5 = inlined_call_operand.hbm [shape: f32[64,128], index: 5, kind: output, shape index: {}]  }
   0x1   :  { %11 = vsyncpa [#allocation6], 0 }
   0x2   :  { %12 = vsyncpa [#allocation4], 0  ;;  %s744_s18 = smov [#allocation5]   ;;  %s745_s20 = smov [#allocation2]  }
   0x3   :  { %s30_s19 = sshll.u32 %s744_s18, 4  ;;  %s18_s21 = sshll.u32 %s745_s20, 4  ;;  %s31_s19 = int_to_ptr.vmem [resolvable:$true] %s30_s19  ;;  %s782_s21 = int_to_ptr.vmem [resolvable:$true] %s18_s21 }
   0x4   :  { %s650_s24 = scalar_lea.hbm %s893_s1, 1024 }
   0x5   :  { %p651_p0 = scmp.ne.s32.totalorder %s893_s1, %s650_s24  ;;  %p654_p1 = scmp.lt.u32.totalorder %s650_s24, %s893_s1 }
   0x7   :  { %p656_p2 = pnand %p654_p1, %p651_p0 }
   0x9   :  { %659 = shalt.err (!%p656_p2)
}
   0xa   :  { %s660_s29 = scalar_lea.vmem %s31_s19, 1024  ;;  %p665_p4 = scmp.lt.s32.totalorder %s31_s19, %s31_s19 }
   0xb   :  { %p661_p3 = scmp.ne.s32.totalorder %s31_s19, %s660_s29  ;;  %p666_p5 = scmp.lt.s32.totalorder %s660_s29, %s660_s29 }
   0xd   :  { %p667_p6 = por %p666_p5, %p665_p4 }
   0xf   :  { %p668_p7 = pnand %p667_p6, %p661_p3 }
  0x11   :  { %671 = shalt.err (!%p668_p7)
}
  0x12   :  { %s746_s30 = smov 64   ;;  %s747_s6 = smov 4  }
  0x13   :  { %36 = dma.hbm_to_vmem [thread:$0]  %s893_s1, 1024, %s31_s19, [#allocation6], %s746_s30, %s746_s30, %s747_s6  }
  0x14   :  { %s672_s11 = scalar_lea.hbm %s892_s0, 512 }
  0x15   :  { %p673_p8 = scmp.ne.s32.totalorder %s892_s0, %s672_s11  ;;  %p676_p9 = scmp.lt.u32.totalorder %s672_s11, %s892_s0 }
  0x17   :  { %p678_p10 = pnand %p676_p9, %p673_p8 }
  0x19   :  { %681 = shalt.err (!%p678_p10)
}
  0x1a   :  { %s682_s16 = scalar_lea.vmem %s782_s21, 512  ;;  %p687_p12 = scmp.lt.s32.totalorder %s782_s21, %s782_s21 }
  0x1b   :  { %p683_p11 = scmp.ne.s32.totalorder %s782_s21, %s682_s16  ;;  %p688_p13 = scmp.lt.s32.totalorder %s682_s16, %s682_s16 }
  0x1d   :  { %p689_p0 = por %p688_p13, %p687_p12 }
  0x1f   :  { %p690_p1 = pnand %p689_p0, %p683_p11 }
  0x21   :  { %693 = shalt.err (!%p690_p1)
}
  0x22   :  { %24 = dma.hbm_to_vmem [thread:$0]  %s892_s0, 512, %s782_s21, [#allocation3], %s746_s30, %s746_s30, %s747_s6  }
  0x23   :  { %s748_s18 = smov [#allocation7]   ;;  %s694_s23 = scalar_lea.hbm %s895_s3, 1024 }
  0x24   :  { %s44_s19 = sshll.u32 %s748_s18, 4  ;;  %p695_p2 = scmp.ne.s32.totalorder %s895_s3, %s694_s23  ;;  %s45_s19 = int_to_ptr.vmem [resolvable:$true] %s44_s19 }
  0x25   :  { %p698_p3 = scmp.lt.u32.totalorder %s694_s23, %s895_s3 }
  0x27   :  { %p700_p4 = pnand %p698_p3, %p695_p2 }
  0x29   :  { %703 = shalt.err (!%p700_p4)
}
  0x2a   :  { %s704_s28 = scalar_lea.vmem %s45_s19, 1024  ;;  %p709_p6 = scmp.lt.s32.totalorder %s45_s19, %s45_s19 }
  0x2b   :  { %p705_p5 = scmp.ne.s32.totalorder %s45_s19, %s704_s28  ;;  %p710_p7 = scmp.lt.s32.totalorder %s704_s28, %s704_s28 }
  0x2d   :  { %p711_p8 = por %p710_p7, %p709_p6 }
  0x2f   :  { %p712_p9 = pnand %p711_p8, %p705_p5 }
  0x31   :  { %715 = shalt.err (!%p712_p9)
}
  0x32   :  { %50 = dma.hbm_to_vmem [thread:$0]  %s895_s3, 1024, %s45_s19, [#allocation6], %s746_s30, %s746_s30, %s747_s6  }
  0x33   :  { %738 = dma.done.wait [#allocation3], 512  }
  0x34   :  { %739 = vsyncadd [#allocation3], 4294966784 }
  0x35   :  { %740 = dma.done.wait [#allocation6], 2048  }
  0x36   :  { %741 = vsyncadd [#allocation6], 4294965248  ;;  %v598_v0 = vld [vmem:[#allocation5] sm:$0xff]   ;;  %v599_v1 = vld [vmem:[#allocation5 + $0x8] sm:$0xff]   ;;  %v379_v49 = vlaneseq }
  0x37   :  { %542 = vmatprep.subr.bf16.mxu0 %v598_v0  ;;  %v600_v2 = vld [vmem:[#allocation5 + $0x10] sm:$0xff]   ;;  %v601_v3 = vld [vmem:[#allocation5 + $0x18] sm:$0xff]   ;;  %v606_v4 = vld [vmem:[#allocation2] sm:$0xff]  }
  0x38   :  { %543 = vmatpush3.bf16.msra.mxu0 %v598_v0  ;;  %558 = vmatprep.mubr.bf16.mxu0 %v606_v4  ;;  %v602_v5 = vld [vmem:[#allocation5 + $0x20] sm:$0xff]   ;;  %v611_v7 = vld [vmem:[#allocation7 + $0x8] sm:$0xff]   ;;  %v612_v9 = vld [vmem:[#allocation7 + $0x10] sm:$0xff]   ;;  %v380_v50 = vand.u32 127, %v379_v49 }
  0x39   :  { %544 = vmatprep.subr.bf16.mxu0 %v599_v1  ;;  %v610_v6 = vld [vmem:[#allocation7] sm:$0xff]   ;;  %v603_v8 = vld [vmem:[#allocation5 + $0x28] sm:$0xff]   ;;  %v604_v10 = vld [vmem:[#allocation5 + $0x30] sm:$0xff]  }
  0x3a   :  { %566 = vmatprep.subr.bf16.mxu1 %v610_v6  ;;  %v613_v11 = vld [vmem:[#allocation7 + $0x18] sm:$0xff]   ;;  %v614_v13 = vld [vmem:[#allocation7 + $0x20] sm:$0xff]   ;;  %v615_v14 = vld [vmem:[#allocation7 + $0x28] sm:$0xff]   ;;  %vm381_vm0 = vcmp.lt.s32.totalorder %v380_v50, 16 }
  0x3b   :  { %567 = vmatpush3.bf16.msra.mxu1 %v610_v6  ;;  %v605_v12 = vld [vmem:[#allocation5 + $0x38] sm:$0xff]   ;;  %v607_v15 = vld [vmem:[#allocation2 + $0x8] sm:$0xff]   ;;  %v608_v16 = vld [vmem:[#allocation2 + $0x10] sm:$0xff]  }
  0x3c   :  { %545 = vmatpush3.bf16.msra.mxu0 %v599_v1  ;;  %568 = vmatprep.subr.bf16.mxu1 %v611_v7  ;;  %v609_v17 = vld [vmem:[#allocation2 + $0x18] sm:$0xff]   ;;  %v616_v18 = vld [vmem:[#allocation7 + $0x30] sm:$0xff]   ;;  %v496_v20 = vld [vmem:[%s894_s2] ss:$0 sm:$0xff] }
  0x3d   :  { %546 = vmatprep.subr.bf16.mxu0 %v600_v2  ;;  %v617_v19 = vld [vmem:[#allocation7 + $0x38] sm:$0xff]   ;;  %v509_v51 = vld [vmem:[%s896_s4] ss:$0 sm:$0xff]  ;;  %s749_s4 = smov [#allocation8]  }
  0x3e   :  { %s483_s6 = sshll.u32 %s749_s4, 4  ;;  %s484_s6 = int_to_ptr.vmem [resolvable:$true] %s483_s6 }
  0x3f   :  { %569 = vmatpush3.bf16.msra.mxu1 %v611_v7  ;;  %s716_s7 = scalar_lea.vmem %s484_s6, 1024  ;;  %p721_p11 = scmp.lt.s32.totalorder %s484_s6, %s484_s6 }
  0x40   :  { %547 = vmatpush3.bf16.msra.mxu0 %v600_v2  ;;  %570 = vmatprep.subr.bf16.mxu1 %v612_v9  ;;  %p717_p10 = scmp.ne.s32.totalorder %s484_s6, %s716_s7  ;;  %p722_p12 = scmp.lt.s32.totalorder %s716_s7, %s716_s7 }
  0x41   :  { %548 = vmatprep.subr.bf16.mxu0 %v601_v3 }
  0x42   :  { %p723_p13 = por %p722_p12, %p721_p11 }
  0x43   :  { %571 = vmatpush3.bf16.msra.mxu1 %v612_v9 }
  0x44   :  { %549 = vmatpush3.bf16.msra.mxu0 %v601_v3  ;;  %572 = vmatprep.subr.bf16.mxu1 %v613_v11  ;;  %p724_p0 = pnand %p723_p13, %p717_p10 }
  0x45   :  { %550 = vmatprep.subr.bf16.mxu0 %v602_v5 }
  0x47   :  { %573 = vmatpush3.bf16.msra.mxu1 %v613_v11 }
  0x48   :  { %551 = vmatpush3.bf16.msra.mxu0 %v602_v5  ;;  %574 = vmatprep.subr.bf16.mxu1 %v614_v13 }
  0x49   :  { %552 = vmatprep.subr.bf16.mxu0 %v603_v8 }
  0x4b   :  { %575 = vmatpush3.bf16.msra.mxu1 %v614_v13 }
  0x4c   :  { %553 = vmatpush3.bf16.msra.mxu0 %v603_v8  ;;  %576 = vmatprep.subr.bf16.mxu1 %v615_v14 }
  0x4d   :  { %554 = vmatprep.subr.bf16.mxu0 %v604_v10 }
  0x4f   :  { %577 = vmatpush3.bf16.msra.mxu1 %v615_v14 }
  0x50   :  { %555 = vmatpush3.bf16.msra.mxu0 %v604_v10  ;;  %578 = vmatprep.subr.bf16.mxu1 %v616_v18 }
  0x51   :  { %556 = vmatprep.subr.bf16.mxu0 %v605_v12 }
  0x53   :  { %579 = vmatpush3.bf16.msra.mxu1 %v616_v18 }
  0x54   :  { %557 = vmatpush3.bf16.msra.mxu0 %v605_v12  ;;  %580 = vmatprep.subr.bf16.mxu1 %v617_v19 }
  0x57   :  { %559 = vmatmul.mubr.bf16.vlgmr.msra.gmra.mrb[0].mxu0 %v607_v15  ;;  %581 = vmatpush3.bf16.msra.mxu1 %v617_v19 }
  0x58   :  { %562 = vmatprep.mubr.bf16.mxu0 %v608_v16 }
  0x5f   :  { %563 = vmatmul.mubr.bf16.gmra.mrb[4].mxu0 %v609_v17 }
 0x12a   :  { %v560_v21 = vpop.f32.mrb[0].mxu0 }
 0x12b   :  { %v209_v22 = vadd.f32 %v560_v21, %v496_v20  ;;  %v200_v23 = vpop.f32.mrb[1].mxu0 }
 0x12c   :  { %v201_v24 = vadd.f32 %v496_v20, %v200_v23  ;;  %v561_v25 = vpop.f32.mrb[2].mxu0 }
 0x12d   :  { %v212_v26 = vadd.f32 %v561_v25, %v496_v20  ;;  %v203_v27 = vpop.f32.mrb[3].mxu0  ;;  %v233_v29 = vmax.f32 %v209_v22, 0.0 }
 0x12e   :  { %v204_v28 = vadd.f32 %v496_v20, %v203_v27  ;;  %v231_v31 = vmax.f32 %v201_v24, 0.0 }
 0x12f   :  { %v234_v30 = vmax.f32 %v212_v26, 0.0 }
 0x130   :  { %v232_v32 = vmax.f32 %v204_v28, 0.0 }
 0x131   :  { %v240_v33 = vpack.c.bf16 %v234_v30, %v233_v29 }
 0x132   :  { %v564_v34 = vpop.f32.mrb[4].mxu0  ;;  %v239_v35 = vpack.c.bf16 %v232_v32, %v231_v31 }
 0x133   :  { %v225_v36 = vadd.f32 %v564_v34, %v496_v20  ;;  %v216_v37 = vpop.f32.mrb[5].mxu0 }
 0x134   :  { %v217_v38 = vadd.f32 %v496_v20, %v216_v37  ;;  %v565_v39 = vpop.f32.mrb[6].mxu0  ;;  %582 = vmatprep.mubr.bf16.mxu1 %v239_v35 }
 0x135   :  { %v237_v40 = vmax.f32 %v225_v36, 0.0  ;;  %v228_v41 = vadd.f32 %v565_v39, %v496_v20  ;;  %v219_v42 = vpop.f32.mrb[7].mxu0  ;;  %583 = vmatmul.mubr.bf16.vlgmr.msra.gmra.mrb[0].mxu1 %v240_v33 }
 0x136   :  { %v220_v43 = vadd.f32 %v496_v20, %v219_v42  ;;  %v235_v45 = vmax.f32 %v217_v38, 0.0 }
 0x137   :  { %v238_v44 = vmax.f32 %v228_v41, 0.0 }
 0x138   :  { %v236_v46 = vmax.f32 %v220_v43, 0.0 }
 0x139   :  { %v242_v47 = vpack.c.bf16 %v238_v44, %v237_v40 }
 0x13a   :  { %v241_v48 = vpack.c.bf16 %v236_v46, %v235_v45 }
 0x13c   :  { %586 = vmatprep.mubr.bf16.mxu1 %v241_v48 }
 0x13d   :  { %587 = vmatmul.mubr.bf16.gmra.mrb[4].mxu1 %v242_v47 }
 0x208   :  { %v584_v52 = vpop.f32.mrb[0].mxu1 }
 0x209   :  { %v357_v53 = vadd.f32 %v584_v52, %v509_v51  ;;  %v348_v54 = vpop.f32.mrb[1].mxu1 }
 0x20a   :  { %v349_v55 = vadd.f32 %v509_v51, %v348_v54  ;;  %v585_v56 = vpop.f32.mrb[2].mxu1 }
 0x20b   :  { %v360_v57 = vadd.f32 %v585_v56, %v509_v51  ;;  %v351_v58 = vpop.f32.mrb[3].mxu1  ;;  %v384_v59 = vsel %vm381_vm0, %v357_v53, -1e+30 }
 0x20c   :  { %v352_v60 = vadd.f32 %v509_v51, %v351_v58  ;;  %394 = vmax.xlane.f32.xlu1 %v384_v59  ;;  %v382_v61 = vsel %vm381_vm0, %v349_v55, -1e+30 }
 0x20d   :  { %390 = vmax.xlane.f32.xlu0 %v382_v61  ;;  %v385_v62 = vsel %vm381_vm0, %v360_v57, -1e+30 }
 0x20e   :  { %v383_v0 = vsel %vm381_vm0, %v352_v60, -1e+30 }
 0x210   :  { %396 = vmax.xlane.f32.xlu1 %v385_v62  ;;  %v588_v63 = vpop.f32.mrb[4].mxu1 }
 0x211   :  { %v364_v1 = vpop.f32.mrb[5].mxu1  ;;  %392 = vmax.xlane.f32.xlu0 %v383_v0  ;;  %v373_v5 = vadd.f32 %v588_v63, %v509_v51 }
 0x212   :  { %v365_v2 = vadd.f32 %v509_v51, %v364_v1  ;;  %v589_v3 = vpop.f32.mrb[6].mxu1 }
 0x213   :  { %v367_v4 = vpop.f32.mrb[7].mxu1  ;;  %v376_v8 = vadd.f32 %v589_v3, %v509_v51  ;;  %v388_v10 = vsel %vm381_vm0, %v373_v5, -1e+30 }
 0x214   :  { %v368_v6 = vadd.f32 %v509_v51, %v367_v4  ;;  %v386_v7 = vsel %vm381_vm0, %v365_v2, -1e+30 }
 0x215   :  { %398 = vmax.xlane.f32.xlu0 %v386_v7  ;;  %v389_v11 = vsel %vm381_vm0, %v376_v8, -1e+30 }
 0x216   :  { %v387_v9 = vsel %vm381_vm0, %v368_v6, -1e+30 }
 0x217   :  { %400 = vmax.xlane.f32.xlu1 %v387_v9 }
 0x219   :  { %402 = vmax.xlane.f32.xlu0 %v388_v10 }
 0x21b   :  { %404 = vmax.xlane.f32.xlu1 %v389_v11 }
 0x299   :  { %v395_v12 = vpop.xlane.xlu1 %394 }
 0x29a   :  { %v848_v13 = vsub.f32 %v384_v59, %v395_v12  ;;  %v391_v14 = vpop.xlane.xlu0 %390 }
 0x29b   :  { %v850_v15 = vsub.f32 %v382_v61, %v391_v14 }
 0x29c   :  { %v418_v16 = vmul.f32 1.442695, %v848_v13 }
 0x29d   :  { %v414_v17 = vmul.f32 1.442695, %v850_v15  ;;  %v397_v18 = vpop.xlane.xlu1 %396 }
 0x29e   :  { %618 = vpow2.f32 %v418_v16  ;;  %v854_v19 = vsub.f32 %v385_v62, %v397_v18  ;;  %v393_v20 = vpop.xlane.xlu0 %392 }
 0x29f   :  { %v856_v21 = vsub.f32 %v383_v0, %v393_v20  ;;  %620 = vpow2.f32 %v414_v17 }
 0x2a0   :  { %v420_v22 = vmul.f32 1.442695, %v854_v19 }
 0x2a1   :  { %v416_v23 = vmul.f32 1.442695, %v856_v21 }
 0x2a2   :  { %622 = vpow2.f32 %v420_v22  ;;  %v399_v24 = vpop.xlane.xlu0 %398 }
 0x2a3   :  { %v860_v25 = vsub.f32 %v386_v7, %v399_v24  ;;  %624 = vpow2.f32 %v416_v23 }
 0x2a4   :  { %v401_v26 = vpop.xlane.xlu1 %400 }
 0x2a5   :  { %v422_v27 = vmul.f32 1.442695, %v860_v25  ;;  %v863_v28 = vsub.f32 %v387_v9, %v401_v26 }
 0x2a6   :  { %v403_v29 = vpop.xlane.xlu0 %402 }
 0x2a7   :  { %626 = vpow2.f32 %v422_v27  ;;  %v424_v30 = vmul.f32 1.442695, %v863_v28  ;;  %v866_v31 = vsub.f32 %v388_v10, %v403_v29 }
 0x2a8   :  { %v619_v32 = vpop.eup %618  ;;  %v405_v33 = vpop.xlane.xlu1 %404 }
 0x2a9   :  { %628 = vpow2.f32 %v424_v30  ;;  %v426_v34 = vmul.f32 1.442695, %v866_v31  ;;  %v869_v35 = vsub.f32 %v389_v11, %v405_v33  ;;  %434 = vadd.xlane.f32.xlu0 %v619_v32  ;;  %v621_v36 = vpop.eup %620 }
 0x2ab   :  { %630 = vpow2.f32 %v426_v34  ;;  %v428_v37 = vmul.f32 1.442695, %v869_v35 }
 0x2ac   :  { %v623_v38 = vpop.eup %622 }
 0x2ad   :  { %632 = vpow2.f32 %v428_v37  ;;  %436 = vadd.xlane.f32.xlu1 %v623_v38  ;;  %430 = vadd.xlane.f32.xlu0 %v621_v36  ;;  %v625_v39 = vpop.eup %624 }
 0x2b1   :  { %v627_v40 = vpop.eup %626  ;;  %432 = vadd.xlane.f32.xlu1 %v625_v39 }
 0x2b2   :  { %438 = vadd.xlane.f32.xlu0 %v627_v40 }
 0x2b3   :  { %v629_v41 = vpop.eup %628 }
 0x2b5   :  { %v631_v42 = vpop.eup %630  ;;  %440 = vadd.xlane.f32.xlu1 %v629_v41 }
 0x2b6   :  { %442 = vadd.xlane.f32.xlu0 %v631_v42 }
 0x2b7   :  { %v633_v43 = vpop.eup %632 }
 0x2b9   :  { %444 = vadd.xlane.f32.xlu1 %v633_v43 }
 0x336   :  { %v435_v44 = vpop.xlane.xlu0 %434 }
 0x337   :  { %634 = vlog2.f32 %v435_v44 }
 0x33a   :  { %v437_v45 = vpop.xlane.xlu1 %436  ;;  %v431_v46 = vpop.xlane.xlu0 %430 }
 0x33b   :  { %636 = vlog2.f32 %v437_v45 }
 0x33c   :  { %638 = vlog2.f32 %v431_v46 }
 0x33e   :  { %v433_v47 = vpop.xlane.xlu1 %432 }
 0x33f   :  { %640 = vlog2.f32 %v433_v47  ;;  %v439_v48 = vpop.xlane.xlu0 %438 }
 0x340   :  { %642 = vlog2.f32 %v439_v48 }
 0x341   :  { %v635_v49 = vpop.eup %634 }
 0x342   :  { %v451_v50 = vmul.f32 0.6931472, %v635_v49  ;;  %v441_v51 = vpop.xlane.xlu1 %440 }
 0x343   :  { %644 = vlog2.f32 %v441_v51  ;;  %v443_v52 = vpop.xlane.xlu0 %442 }
 0x344   :  { %v464_v53 = vsub.f32 %v848_v13, %v451_v50  ;;  %646 = vlog2.f32 %v443_v52 }
 0x345   :  { %v637_v54 = vpop.eup %636 }
 0x346   :  { %v639_v55 = vpop.eup %638  ;;  %472 = vst [vmem:[#allocation8 + $0x10] sm:$0xff] %v464_v53  ;;  %v453_v56 = vmul.f32 0.6931472, %v637_v54  ;;  %v445_v57 = vpop.xlane.xlu1 %444 }
 0x347   :  { %v447_v58 = vmul.f32 0.6931472, %v639_v55  ;;  %648 = vlog2.f32 %v445_v57 }
 0x348   :  { %v465_v59 = vsub.f32 %v854_v19, %v453_v56 }
 0x349   :  { %v641_v60 = vpop.eup %640  ;;  %v462_v61 = vsub.f32 %v850_v15, %v447_v58 }
 0x34a   :  { %v643_v62 = vpop.eup %642  ;;  %473 = vst [vmem:[#allocation8 + $0x18] sm:$0xff] %v465_v59  ;;  %v449_v63 = vmul.f32 0.6931472, %v641_v60 }
 0x34b   :  { %470 = vst [vmem:[#allocation8] sm:$0xff] %v462_v61  ;;  %v455_v0 = vmul.f32 0.6931472, %v643_v62 }
 0x34c   :  { %v463_v1 = vsub.f32 %v856_v21, %v449_v63 }
 0x34d   :  { %v645_v2 = vpop.eup %644  ;;  %v466_v3 = vsub.f32 %v860_v25, %v455_v0 }
 0x34e   :  { %v647_v4 = vpop.eup %646  ;;  %471 = vst [vmem:[#allocation8 + $0x8] sm:$0xff] %v463_v1  ;;  %v457_v5 = vmul.f32 0.6931472, %v645_v2 }
 0x34f   :  { %474 = vst [vmem:[#allocation8 + $0x20] sm:$0xff] %v466_v3  ;;  %v459_v6 = vmul.f32 0.6931472, %v647_v4 }
 0x350   :  { %v467_v7 = vsub.f32 %v863_v28, %v457_v5 }
 0x351   :  { %v649_v8 = vpop.eup %648  ;;  %v468_v9 = vsub.f32 %v866_v31, %v459_v6 }
 0x352   :  { %475 = vst [vmem:[#allocation8 + $0x28] sm:$0xff] %v467_v7  ;;  %v461_v10 = vmul.f32 0.6931472, %v649_v8 }
 0x353   :  { %476 = vst [vmem:[#allocation8 + $0x30] sm:$0xff] %v468_v9 }
 0x354   :  { %v469_v11 = vsub.f32 %v869_v35, %v461_v10 }
 0x356   :  { %477 = vst [vmem:[#allocation8 + $0x38] sm:$0xff] %v469_v11 }
 0x357   :  { %727 = shalt.err (!%p724_p0)
}
 0x358   :  { %s728_s10 = scalar_lea.hbm %s897_s5, 1024 }
 0x359   :  { %p729_p1 = scmp.ne.s32.totalorder %s897_s5, %s728_s10  ;;  %p732_p2 = scmp.lt.u32.totalorder %s728_s10, %s897_s5 }
 0x35b   :  { %p734_p3 = pnand %p732_p2, %p729_p1 }
 0x35d   :  { %737 = shalt.err (!%p734_p3)
}
 0x35e   :  { %s750_s15 = smov 128   ;;  %s751_s16 = smov 8  }
 0x35f   :  { %489 = dma.vmem_to_hbm [thread:$0]  %s484_s6, 1024, %s897_s5, [#allocation4], %s750_s15, %s750_s15, %s751_s16  }
 0x360   :  { %742 = dma.done.wait [#allocation4], 1024  }
 0x361   :  { %743 = vsyncadd [#allocation4], 4294966272 }
 0x362   :  { %493 = vsyncpa [#allocation3], 1 }
 0x363   :  { %494 = vsyncpa [#allocation6], 1 }
 0x364   :  { %495 = vsyncpa [#allocation4], 1 }

</bundles_post_ra>
